<compile_context>
chip_gen: v7x
topology: tpu7x:2x2x1
jax: 0.10.0
libtpu: 0.0.40
codegen_flags: <defaults>
</compile_context>

<pallas_src>
import jax
import jax.numpy as jnp
from jax.experimental import pallas as pl
from jax.experimental.pallas import tpu as pltpu


def _round_up(x, m):
    return -(-x // m) * m


def _pick_tile(dim, target, granule):
    """Largest tile <= target that is a multiple of `granule` and divides `dim`.
    `dim` must already be a multiple of `granule` (caller pads first)."""
    if dim <= target:
        return dim
    t = (target // granule) * granule
    while t > granule:
        if dim % t == 0:
            return t
        t -= granule
    return granule


def _conv1d_kernel_acc(x_ref, w_ref, b_ref, o_ref, acc_ref):
    """Generic path: f32 VMEM accumulator, downcast + bias at k == last."""
    k = pl.program_id(2)

    @pl.when(k == 0)
    def _init():
        acc_ref[...] = jnp.zeros_like(acc_ref)

    acc_ref[...] += jnp.dot(x_ref[...], w_ref[...],
                            preferred_element_type=jnp.float32)

    @pl.when(k == pl.num_programs(2) - 1)
    def _finalize():
        o_ref[...] = (acc_ref[...] + b_ref[...]).astype(o_ref.dtype)


def _conv1d_kernel_f32(x_ref, w_ref, b_ref, o_ref):
    """f32-output path: accumulate directly into the resident output block."""
    k = pl.program_id(2)

    @pl.when(k == 0)
    def _init():
        o_ref[...] = jnp.zeros_like(o_ref)

    o_ref[...] += jnp.dot(x_ref[...], w_ref[...],
                          preferred_element_type=jnp.float32)

    @pl.when(k == pl.num_programs(2) - 1)
    def _bias():
        o_ref[...] += b_ref[...]


def conv1d_forward(x, weight, bias=None, *, tm=512, tn=512, tk=512,
                   compute_dtype=jnp.bfloat16):
    """GPT Conv1D forward: y[..., f] = sum_k x[..., k] * weight[k, f] + bias[f].

    compute_dtype: dtype of the MXU operands (default bf16; accumulation is
    always f32).  Pass None to keep the operands in x.dtype (exact f32 addmm).
    """
    nx, nf = weight.shape
    orig_shape = x.shape
    assert orig_shape[-1] == nx, "last dim of x must equal nx"

    out_dtype = jnp.dtype(x.dtype)
    x2d = x.reshape(-1, nx)
    m = x2d.shape[0]

    if bias is None:
        bias = jnp.zeros((nf,), dtype=jnp.float32)

    # ---- MXU operand dtype (bf16 by default, f32 accumulation in-kernel). ----
    in_dtype = jnp.dtype(compute_dtype) if compute_dtype is not None else out_dtype
    if x2d.dtype != in_dtype:
        x2d = x2d.astype(in_dtype)
    if weight.dtype != in_dtype:
        weight = weight.astype(in_dtype)

    # ---- Pad K and N up to lane (128) multiples so every block is lane-dense
    #      and small.  Zero rows/cols contribute nothing; extra N is sliced. ----
    k_pad = _round_up(nx, 128)
    n_pad = _round_up(nf, 128)
    if k_pad != nx:
        x2d = jnp.pad(x2d, ((0, 0), (0, k_pad - nx)))
        weight = jnp.pad(weight, ((0, k_pad - nx), (0, 0)))
    if n_pad != nf:
        weight = jnp.pad(weight, ((0, 0), (0, n_pad - nf)))
        bias = jnp.pad(bias, (0, n_pad - nf))
    b2d = bias.reshape(1, n_pad).astype(jnp.float32)

    # ---- Tile selection: MXU-sized, (8,128)-legal, footprint-bounded. ----
    packing = max(8, 32 // jnp.dtype(in_dtype).itemsize)   # sublane packing
    tk_eff = _pick_tile(k_pad, tk, 128)
    tn_eff = _pick_tile(n_pad, tn, 128)
    tm_eff = min(tm, _round_up(m, packing))

    m_blocks = pl.cdiv(m, tm_eff)          # ragged M -> Pallas edge block
    # Keep both v7x TensorCores busy on tiny-M (decode) shapes.
    if m_blocks * (n_pad // tn_eff) < 2 and n_pad // 2 >= 128:
        tn_eff = _pick_tile(n_pad, max(128, tn_eff // 2), 128)
    n_blocks = n_pad // tn_eff
    k_blocks = k_pad // tk_eff
    grid = (m_blocks, n_blocks, k_blocks)

    use_scratch = out_dtype != jnp.dtype(jnp.float32)
    kernel = _conv1d_kernel_acc if use_scratch else _conv1d_kernel_f32
    scratch = [pltpu.VMEM((tm_eff, tn_eff), jnp.float32)] if use_scratch else []

    # ---- Explicit VMEM budget: double-buffered x/W/bias/out (+ scratch),
    #      with headroom, capped below v7x's 64 MiB physical VMEM. ----
    in_item = jnp.dtype(in_dtype).itemsize
    out_item = out_dtype.itemsize
    vmem_bytes = (2 * (tm_eff * tk_eff + tk_eff * tn_eff) * in_item
                  + 2 * tn_eff * 4
                  + 2 * tm_eff * tn_eff * out_item
                  + (tm_eff * tn_eff * 4 if use_scratch else 0))
    vmem_limit = int(min(56 * 2**20, max(32 * 2**20, int(vmem_bytes * 1.5))))

    # Advisory cost: account for the streaming re-reads (x per N-tile, W per M-tile).
    cost = pl.CostEstimate(
        flops=2 * m * k_pad * n_pad,
        transcendentals=0,
        bytes_accessed=int(m * k_pad * in_item * n_blocks
                           + k_pad * n_pad * in_item * m_blocks
                           + n_pad * 4
                           + m * n_pad * out_item),
    )

    out = pl.pallas_call(
        kernel,
        out_shape=jax.ShapeDtypeStruct((m, n_pad), out_dtype),
        grid_spec=pltpu.PrefetchScalarGridSpec(
            num_scalar_prefetch=0,
            grid=grid,
            in_specs=[
                # Activations: (tm, tk) tile, streamed over M and K.
                pl.BlockSpec((tm_eff, tk_eff), lambda i, j, k: (i, k)),
                # Weight: (tk, tn) tile, streamed over K and N (never fully
                # resident -> bounded VMEM even for GPT-sized layers).
                pl.BlockSpec((tk_eff, tn_eff), lambda i, j, k: (k, j)),
                # Bias row: (1, tn) tile, constant across i and k.
                pl.BlockSpec((1, tn_eff), lambda i, j, k: (0, j)),
            ],
            out_specs=pl.BlockSpec((tm_eff, tn_eff), lambda i, j, k: (i, j)),
            scratch_shapes=scratch,
        ),
        compiler_params=pltpu.CompilerParams(
            dimension_semantics=("parallel", "parallel", "arbitrary"),
            vmem_limit_bytes=vmem_limit,
        ),
        cost_estimate=cost,
    )(x2d, weight, b2d)

    if n_pad != nf:
        out = out[:, :nf]
    return out.reshape(orig_shape[:-1] + (nf,))


def init_weight(key, nx, nf, std=0.02, dtype=jnp.float32):
    # torch.nn.init.normal_(weight, std=0.02) equivalent, deterministic.
    return (std * jax.random.normal(key, (nx, nf))).astype(dtype)


if __name__ == "__main__":
    key = jax.random.PRNGKey(0)
    kx, kw, kx2, kw2, kb2, kx3, kw3 = jax.random.split(key, 7)

    # --- Small GPT-like check (bias == zeros, exactly like the PyTorch module). ---
    batch, seq, nx, nf = 2, 8, 32, 32
    x = jax.random.normal(kx, (batch, seq, nx), dtype=jnp.float32)
    w = init_weight(kw, nx, nf)
    y = jax.block_until_ready(conv1d_forward(x, w))
    y_ref = (x.reshape(-1, nx) @ w).reshape(batch, seq, nf)
    assert y.shape == (batch, seq, nf)
    assert jnp.allclose(y, y_ref, atol=2e-2, rtol=2e-2), "small case mismatch"

    # --- Larger check: multi-block N/K grid, ragged M (edge block, no jnp.pad
    #     of x), non-128 nf (padded weight/bias), fused addmm bias, f32
    #     accumulate-directly-into-output path. ---
    batch2, seq2, nx2, nf2 = 3, 100, 1024, 384
    x2 = jax.random.normal(kx2, (batch2, seq2, nx2), dtype=jnp.float32)
    w2 = init_weight(kw2, nx2, nf2)
    b2 = jax.random.normal(kb2, (nf2,), dtype=jnp.float32)
    y2 = jax.block_until_ready(conv1d_forward(x2, w2, b2))
    y2_ref = (x2.reshape(-1, nx2) @ w2 + b2).reshape(batch2, seq2, nf2)
    assert y2.shape == (batch2, seq2, nf2)
    assert jnp.allclose(y2, y2_ref, atol=7e-2, rtol=7e-2), "large case mismatch"

    # --- bf16 activations/weights (exercises the scratch-accumulator path). ---
    batch3, seq3, nx3, nf3 = 2, 16, 256, 256
    x3 = jax.random.normal(kx3, (batch3, seq3, nx3),
                           dtype=jnp.float32).astype(jnp.bfloat16)
    w3 = init_weight(kw3, nx3, nf3, dtype=jnp.bfloat16)
    y3 = jax.block_until_ready(conv1d_forward(x3, w3))
    y3_ref = (x3.astype(jnp.float32).reshape(-1, nx3)
              @ w3.astype(jnp.float32)).reshape(batch3, seq3, nf3)
    assert y3.shape == (batch3, seq3, nf3)
    assert jnp.allclose(y3.astype(jnp.float32), y3_ref,
                        atol=5e-2, rtol=5e-2), "bf16 case mismatch"

    print("KERNEL_OK")
</pallas_src>

<mosaic_0001>
module attributes {stable_mosaic.version = 11 : i64} {
  func.func @_conv1d_kernel_f32(%arg0: i32, %arg1: i32, %arg2: i32, %arg3: memref<16x128xbf16, #tpu.memory_space<vmem>>, %arg4: memref<128x128xbf16, #tpu.memory_space<vmem>>, %arg5: memref<1x128xf32, #tpu.memory_space<vmem>>, %arg6: memref<16x128xf32, #tpu.memory_space<vmem>>) attributes {dimension_semantics = [#tpu.dimension_semantics<parallel>, #tpu.dimension_semantics<parallel>, #tpu.dimension_semantics<arbitrary>], iteration_bounds = array<i64: 1, 1, 1>, scalar_prefetch = 0 : i64, scratch_operands = 0 : i64, tpu.core_type = #tpu.core_type<tc>, window_params = [{transform_indices = @transform_0, window_bounds = array<i64: 16, 128>}, {transform_indices = @transform_1, window_bounds = array<i64: 128, 128>}, {transform_indices = @transform_2, window_bounds = array<i64: 1, 128>}, {transform_indices = @transform_3, window_bounds = array<i64: 16, 128>}]} {
    %c0_i32 = arith.constant 0 : i32
    %0 = arith.cmpi eq, %arg2, %c0_i32 : i32
    %1 = arith.extui %0 : i1 to i32
    %c0_i32_0 = arith.constant 0 : i32
    %2 = arith.cmpi ne, %1, %c0_i32_0 : i32
    scf.if %2 {
      %cst_10 = arith.constant 0.000000e+00 : f32
      %12 = vector.broadcast %cst_10 : f32 to vector<16x128xf32>
      %c0_11 = arith.constant 0 : index
      %c0_12 = arith.constant 0 : index
      %13 = vector.load %arg6[%c0_11, %c0_12] : memref<16x128xf32, #tpu.memory_space<vmem>>, vector<16x128xf32>
      tpu.vector_store %arg6[%c0_11, %c0_12], %12 {strides = array<i32>} : memref<16x128xf32, #tpu.memory_space<vmem>>, vector<16x128xf32>,
    } else {
    }
    %c0 = arith.constant 0 : index
    %c0_1 = arith.constant 0 : index
    %3 = vector.load %arg6[%c0, %c0_1] : memref<16x128xf32, #tpu.memory_space<vmem>>, vector<16x128xf32>
    %c0_2 = arith.constant 0 : index
    %c0_3 = arith.constant 0 : index
    %4 = vector.load %arg3[%c0_2, %c0_3] : memref<16x128xbf16, #tpu.memory_space<vmem>>, vector<16x128xbf16>
    %c0_4 = arith.constant 0 : index
    %c0_5 = arith.constant 0 : index
    %5 = vector.load %arg4[%c0_4, %c0_5] : memref<128x128xbf16, #tpu.memory_space<vmem>>, vector<128x128xbf16>
    %cst = arith.constant dense<0.000000e+00> : vector<16x128xf32>
    %6 = tpu.matmul %4, %5, %cst {dimension_numbers = #tpu.dot_dimension_numbers<[1], [0], [0], [1], [0, 0, 1, 1], [], []>} : vector<16x128xbf16>, vector<128x128xbf16>, vector<16x128xf32> -> vector<16x128xf32>
    %7 = arith.addf %3, %6 : vector<16x128xf32>
    %c0_6 = arith.constant 0 : index
    %c0_7 = arith.constant 0 : index
    %8 = vector.load %arg6[%c0_6, %c0_7] : memref<16x128xf32, #tpu.memory_space<vmem>>, vector<16x128xf32>
    tpu.vector_store %arg6[%c0_6, %c0_7], %7 {strides = array<i32>} : memref<16x128xf32, #tpu.memory_space<vmem>>, vector<16x128xf32>,
    %c0_i32_8 = arith.constant 0 : i32
    %9 = arith.cmpi eq, %arg2, %c0_i32_8 : i32
    %10 = arith.extui %9 : i1 to i32
    %c0_i32_9 = arith.constant 0 : i32
    %11 = arith.cmpi ne, %10, %c0_i32_9 : i32
    scf.if %11 {
      %c0_10 = arith.constant 0 : index
      %c0_11 = arith.constant 0 : index
      %12 = vector.load %arg6[%c0_10, %c0_11] : memref<16x128xf32, #tpu.memory_space<vmem>>, vector<16x128xf32>
      %c0_12 = arith.constant 0 : index
      %c0_13 = arith.constant 0 : index
      %13 = vector.load %arg5[%c0_12, %c0_13] : memref<1x128xf32, #tpu.memory_space<vmem>>, vector<1x128xf32>
      %14 = vector.broadcast %13 : vector<1x128xf32> to vector<16x128xf32>
      %15 = arith.addf %12, %14 : vector<16x128xf32>
      %c0_14 = arith.constant 0 : index
      %c0_15 = arith.constant 0 : index
      %16 = vector.load %arg6[%c0_14, %c0_15] : memref<16x128xf32, #tpu.memory_space<vmem>>, vector<16x128xf32>
      tpu.vector_store %arg6[%c0_14, %c0_15], %15 {strides = array<i32>} : memref<16x128xf32, #tpu.memory_space<vmem>>, vector<16x128xf32>,
    } else {
    }
    return
  }
  func.func @transform_0(%arg0: i32, %arg1: i32, %arg2: i32) -> (i32, i32) {
    %c0_i32 = arith.constant 0 : i32
    return %arg0, %arg2 : i32, i32
  }
  func.func @transform_1(%arg0: i32, %arg1: i32, %arg2: i32) -> (i32, i32) {
    %c0_i32 = arith.constant 0 : i32
    return %arg2, %arg1 : i32, i32
  }
  func.func @transform_2(%arg0: i32, %arg1: i32, %arg2: i32) -> (i32, i32) {
    %c0_i32 = arith.constant 0 : i32
    %c0_i32_0 = arith.constant 0 : i32
    return %c0_i32, %arg1 : i32, i32
  }
  func.func @transform_3(%arg0: i32, %arg1: i32, %arg2: i32) -> (i32, i32) {
    %c0_i32 = arith.constant 0 : i32
    return %arg0, %arg1 : i32, i32
  }
}

</mosaic_0001>

<bundles_post_ra>
// kernel: tpu_custom_call.1
= control target key start
LH: loop header
LB: loop body
LE: loop exit
PB: predicated region body
PF: predicated region fallthrough
CT: control target
= control target key end

     0   :  { %8 = vsyncpa [#allocation3], 0  ;;  %s400_s0 = inlined_call_operand.hbm [shape: bf16[16,128], index: 0, kind: input, shape index: {}]   ;;  %s401_s1 = inlined_call_operand.hbm [shape: bf16[128,128], index: 1, kind: input, shape index: {}]   ;;  %s402_s2 = inlined_call_operand.vmem [shape: f32[1,128], index: 2, kind: input, shape index: {}]   ;;  %s403_s3 = inlined_call_operand.hbm [shape: f32[16,128], index: 3, kind: output, shape index: {}]  }
   0x1   :  { %9 = vsyncpa [#allocation6], 0 }
   0x2   :  { %10 = vsyncpa [#allocation4], 0  ;;  %s332_s12 = smov [#allocation2]   ;;  %s260_s16 = scalar_lea.hbm %s400_s0, 128 }
   0x3   :  { %s16_s13 = sshll.u32 %s332_s12, 4  ;;  %p261_p0 = scmp.ne.s32.totalorder %s400_s0, %s260_s16  ;;  %s17_s13 = int_to_ptr.vmem [resolvable:$true] %s16_s13 }
   0x4   :  { %p264_p1 = scmp.lt.u32.totalorder %s260_s16, %s400_s0 }
   0x6   :  { %p266_p2 = pnand %p264_p1, %p261_p0 }
   0x8   :  { %269 = shalt.err (!%p266_p2)
}
   0x9   :  { %s270_s21 = scalar_lea.vmem %s17_s13, 128  ;;  %p275_p4 = scmp.lt.s32.totalorder %s17_s13, %s17_s13 }
   0xa   :  { %p271_p3 = scmp.ne.s32.totalorder %s17_s13, %s270_s21  ;;  %p276_p5 = scmp.lt.s32.totalorder %s270_s21, %s270_s21 }
   0xc   :  { %p277_p6 = por %p276_p5, %p275_p4 }
   0xe   :  { %p278_p7 = pnand %p277_p6, %p271_p3 }
  0x10   :  { %281 = shalt.err (!%p278_p7)
}
  0x11   :  { %s333_s22 = smov 64   ;;  %s334_s23 = smov 4  }
  0x12   :  { %22 = dma.hbm_to_vmem [thread:$0]  %s400_s0, 128, %s17_s13, [#allocation3], %s333_s22, %s333_s22, %s334_s23  }
  0x13   :  { %s335_s26 = smov [#allocation5]   ;;  %s282_s30 = scalar_lea.hbm %s401_s1, 1024 }
  0x14   :  { %s28_s27 = sshll.u32 %s335_s26, 4  ;;  %p283_p8 = scmp.ne.s32.totalorder %s401_s1, %s282_s30  ;;  %s29_s27 = int_to_ptr.vmem [resolvable:$true] %s28_s27 }
  0x15   :  { %p286_p9 = scmp.lt.u32.totalorder %s282_s30, %s401_s1 }
  0x17   :  { %p288_p10 = pnand %p286_p9, %p283_p8 }
  0x19   :  { %291 = shalt.err (!%p288_p10)
}
  0x1a   :  { %s292_s8 = scalar_lea.vmem %s29_s27, 1024  ;;  %p297_p12 = scmp.lt.s32.totalorder %s29_s27, %s29_s27 }
  0x1b   :  { %p293_p11 = scmp.ne.s32.totalorder %s29_s27, %s292_s8  ;;  %p298_p13 = scmp.lt.s32.totalorder %s292_s8, %s292_s8 }
  0x1d   :  { %p299_p0 = por %p298_p13, %p297_p12 }
  0x1f   :  { %p300_p1 = pnand %p299_p0, %p293_p11 }
  0x21   :  { %303 = shalt.err (!%p300_p1)
}
  0x22   :  { %34 = dma.hbm_to_vmem [thread:$0]  %s401_s1, 1024, %s29_s27, [#allocation6], %s333_s22, %s333_s22, %s334_s23  }
  0x23   :  { %326 = dma.done.wait [#allocation3], 128  }
  0x24   :  { %327 = vsyncadd [#allocation3], 4294967168 }
  0x25   :  { %328 = dma.done.wait [#allocation6], 1024  }
  0x26   :  { %329 = vsyncadd [#allocation6], 4294966272  ;;  %v336_v0 = vmov 0.0   ;;  %vm337_vm0 = vmmov 0   ;;  %v251_v1 = vld [vmem:[#allocation5] sm:$0xff]   ;;  %v252_v2 = vld [vmem:[#allocation5 + $0x8] sm:$0xff]  }
  0x27   :  { %222 = vmatprep.subr.bf16.mxu0 %v336_v0  ;;  %238 = vmatprep.mubr.msk.bf16.mxu0 %vm337_vm0, %v336_v0  ;;  %v253_v3 = vld [vmem:[#allocation5 + $0x10] sm:$0xff]   ;;  %v254_v4 = vld [vmem:[#allocation5 + $0x18] sm:$0xff]   ;;  %v255_v5 = vld [vmem:[#allocation5 + $0x20] sm:$0xff]   ;;  %s338_s11 = smov [#allocation7]  }
  0x28   :  { %223 = vmatpush3.bf16.msra.mxu0 %v251_v1  ;;  %v256_v6 = vld [vmem:[#allocation5 + $0x28] sm:$0xff]   ;;  %v257_v7 = vld [vmem:[#allocation5 + $0x30] sm:$0xff]   ;;  %v258_v8 = vld [vmem:[#allocation5 + $0x38] sm:$0xff]   ;;  %s190_s12 = sshll.u32 %s338_s11, 4  ;;  %s191_s12 = int_to_ptr.vmem [resolvable:$true] %s190_s12 }
  0x29   :  { %224 = vmatprep.subr.bf16.mxu0 %v336_v0  ;;  %v259_v9 = vld [vmem:[#allocation2] sm:$0xff]   ;;  %s304_s13 = scalar_lea.vmem %s191_s12, 256  ;;  %p309_p3 = scmp.lt.s32.totalorder %s191_s12, %s191_s12 }
  0x2a   :  { %v212_v11 = vld [vmem:[%s402_s2] ss:$0 sm:$0xff]  ;;  %p305_p2 = scmp.ne.s32.totalorder %s191_s12, %s304_s13  ;;  %p310_p4 = scmp.lt.s32.totalorder %s304_s13, %s304_s13 }
  0x2c   :  { %225 = vmatpush3.bf16.msra.mxu0 %v252_v2  ;;  %p311_p5 = por %p310_p4, %p309_p3 }
  0x2d   :  { %226 = vmatprep.subr.bf16.mxu0 %v336_v0 }
  0x2e   :  { %p312_p6 = pnand %p311_p5, %p305_p2 }
  0x30   :  { %227 = vmatpush3.bf16.msra.mxu0 %v253_v3 }
  0x31   :  { %228 = vmatprep.subr.bf16.mxu0 %v336_v0 }
  0x34   :  { %229 = vmatpush3.bf16.msra.mxu0 %v254_v4 }
  0x35   :  { %230 = vmatprep.subr.bf16.mxu0 %v336_v0 }
  0x38   :  { %231 = vmatpush3.bf16.msra.mxu0 %v255_v5 }
  0x39   :  { %232 = vmatprep.subr.bf16.mxu0 %v336_v0 }
  0x3c   :  { %233 = vmatpush3.bf16.msra.mxu0 %v256_v6 }
  0x3d   :  { %234 = vmatprep.subr.bf16.mxu0 %v336_v0 }
  0x40   :  { %235 = vmatpush3.bf16.msra.mxu0 %v257_v7 }
  0x41   :  { %236 = vmatprep.subr.bf16.mxu0 %v336_v0 }
  0x44   :  { %237 = vmatpush3.bf16.msra.mxu0 %v258_v8 }
  0x47   :  { %239 = vmatmul.mubr.bf16.vlgmr.msra.gmra.mrb[0].mxu0 %v259_v9 }
 0x11a   :  { %v158_v10 = vpop.f32.mrb[0].mxu0 }
 0x11b   :  { %v240_v12 = vpop.f32.mrb[1].mxu0  ;;  %v181_v15 = vadd.f32 %v212_v11, %v158_v10 }
 0x11c   :  { %v161_v13 = vpop.f32.mrb[2].mxu0 }
 0x11d   :  { %v241_v14 = vpop.f32.mrb[3].mxu0  ;;  %v182_v16 = vadd.f32 %v212_v11, %v161_v13  ;;  %183 = vst [vmem:[#allocation7] sm:$0xff] %v181_v15 }
 0x11f   :  { %184 = vst [vmem:[#allocation7 + $0x8] sm:$0xff] %v182_v16 }
 0x120   :  { %315 = shalt.err (!%p312_p6)
}
 0x121   :  { %s316_s2 = scalar_lea.hbm %s403_s3, 256 }
 0x122   :  { %p317_p7 = scmp.ne.s32.totalorder %s403_s3, %s316_s2  ;;  %p320_p8 = scmp.lt.u32.totalorder %s316_s2, %s403_s3 }
 0x124   :  { %p322_p9 = pnand %p320_p8, %p317_p7 }
 0x126   :  { %325 = shalt.err (!%p322_p9)
}
 0x127   :  { %s339_s20 = smov 128   ;;  %s340_s21 = smov 8  }
 0x128   :  { %196 = dma.vmem_to_hbm [thread:$0]  %s191_s12, 256, %s403_s3, [#allocation4], %s339_s20, %s339_s20, %s340_s21  }
 0x129   :  { %330 = dma.done.wait [#allocation4], 256  }
 0x12a   :  { %331 = vsyncadd [#allocation4], 4294967040 }
 0x12b   :  { %200 = vsyncpa [#allocation3], 1 }
 0x12c   :  { %201 = vsyncpa [#allocation6], 1 }
 0x12d   :  { %202 = vsyncpa [#allocation4], 1 }

</bundles_post_ra>
